<compile_context>
chip_gen: v5e
topology: v5e:2x2
jax: 0.10.0
libtpu: 0.0.40
codegen_flags: <defaults>
</compile_context>

<pallas_src>
import functools

import jax
import jax.numpy as jnp
from jax import lax
from jax.experimental import pallas as pl
from jax.experimental.pallas import tpu as pltpu


_LANE = 128                         # VMEM lane width.
_TGT_ROW_BYTES = _LANE * 4          # (tile_n, 1) int32 block lane-pads to 128 lanes.
_MAX_TILE_ROWS = 32768              # upper cap on rows per tile.


def _vmem_capacity_bytes() -> int:
    """Per-core VMEM capacity, with a conservative fallback."""
    try:
        return int(pltpu.get_tpu_info().vmem_capacity_bytes)
    except Exception:
        pass
    try:
        kind = jax.devices()[0].device_kind.lower()
        if "v7" in kind:
            return 64 * 2**20
        return 128 * 2**20          # v5e / v6e parts have 128 MiB per core
    except Exception:
        return 64 * 2**20           # safe on every generation


def _focal_weight(base, gamma: float):
    """base**gamma with base >= 0.  Integer gamma -> plain VALU multiplies."""
    g = float(gamma)
    if g == 0.0:
        return jnp.ones_like(base)
    if g == int(g) and 0 < int(g) <= 16:
        w = base
        for _ in range(int(g) - 1):
            w = w * base
        return w
    # Non-integer gamma: exp(g*log(base)) with base clamped away from 0.
    # When base == 0, logp == 0 as well, so loss = weight * 0 = 0 regardless.
    safe_base = jnp.maximum(base, jnp.float32(1e-30))
    return jnp.exp(jnp.float32(g) * jnp.log(safe_base))


def _focal_loss_kernel(logits_ref, target_ref, out_ref, acc_ref, *,
                       gamma: float, n_total: int, tiles_per_split: int):
    """One (tile_n, C) tile: masked focal-CE partial sum into a resident acc."""
    i = pl.program_id(0)            # core split index ("parallel")
    j = pl.program_id(1)            # tile index within the split ("arbitrary")

    @pl.when(j == 0)
    def _init():
        acc_ref[...] = jnp.zeros_like(acc_ref)

    x = logits_ref[...].astype(jnp.float32)      # (tn, c)
    tgt = target_ref[...]                        # (tn, 1) int32
    tn, c = x.shape

    # Global tile id (UNCLAMPED - the index_map clamps separately).  Rows at or
    # beyond n_total are masked: this covers both the ragged last tile (stale /
    # garbage VMEM rows) and the duplicate tile created by an odd 2-way split.
    t = i * tiles_per_split + j
    row_ids = t * tn + lax.broadcasted_iota(jnp.int32, (tn, 1), 0)
    valid = row_ids < n_total

    # Numerically stable log-sum-exp over the class (lane) axis.
    m = jnp.max(x, axis=-1, keepdims=True)                                # (tn,1)
    lse = m + jnp.log(jnp.sum(jnp.exp(x - m), axis=-1, keepdims=True))    # (tn,1)

    # Target logit via one-hot select + lane reduce (no dynamic gather on TPU).
    col_ids = lax.broadcasted_iota(jnp.int32, (tn, c), 1)
    tgt_logit = jnp.sum(jnp.where(col_ids == tgt, x, jnp.float32(0.0)),
                        axis=-1, keepdims=True)                           # (tn,1)

    # Per-sample CE, clamped >= 0 so 1 - exp(-logp) >= 0 (no NaN in the power).
    logp = jnp.maximum(lse - tgt_logit, jnp.float32(0.0))
    p = jnp.exp(-logp)
    loss = _focal_weight(1.0 - p, gamma) * logp
    # True select (not multiply-by-mask): NaN/Inf in masked rows do not propagate.
    loss = jnp.where(valid, loss, jnp.float32(0.0))

    acc_ref[...] += jnp.sum(loss, axis=0, keepdims=True)                  # (1,1)

    @pl.when(j == pl.num_programs(1) - 1)
    def _finalize():
        out_ref[...] = acc_ref[...].reshape(out_ref.shape)   # un-normalized partial


def focal_loss(logits: jax.Array, target: jax.Array,
               gamma: float = 0.0, eps: float = 1e-07, *,
               max_tile_n: int | None = None) -> jax.Array:
    """Pallas implementation of FocalLoss.forward.

    logits: (N, C) float array (f32 or bf16, streamed as-is to the kernel).
    target: (N,) integer class indices.
    Returns a scalar float32 (mean focal loss).
    """
    del eps  # defined but never used in the PyTorch forward
    n, c = logits.shape
    itemsize = jnp.dtype(logits.dtype).itemsize

    # ---- generation-aware tile sizing (size by bytes, not by a row cap) ----
    vmem_capacity = _vmem_capacity_bytes()
    if vmem_capacity <= 64 * 2**20:        # v7x: 64 MiB per TensorCore
        input_budget = 36 * 2**20
    else:                                   # v5e / v6e: 128 MiB per core
        input_budget = 72 * 2**20

    # Per row, per buffer: one logits row + the lane-padded int32 target row.
    row_bytes = c * itemsize + _TGT_ROW_BYTES
    tile_n = input_budget // (2 * row_bytes)          # 2x double-buffered inputs
    if max_tile_n is not None:
        tile_n = min(tile_n, int(max_tile_n))
    n_pad8 = ((n + 7) // 8) * 8
    # Ensure at least two row tiles so the 2-way core split has work on v7x.
    half_rows = ((pl.cdiv(n, 2) + 7) // 8) * 8
    tile_n = min(tile_n, _MAX_TILE_ROWS, n_pad8, max(8, half_rows))
    tile_n = max(8, (tile_n // 8) * 8)

    num_tiles = pl.cdiv(n, tile_n)
    n_split = 2 if num_tiles >= 2 else 1
    tiles_per_split = pl.cdiv(num_tiles, n_split)
    last_block = num_tiles - 1

    # Only the tiny target vector is touched in the wrapper; logits stream
    # straight from HBM (no padding copy of the (N, C) tensor).
    target2d = target.astype(jnp.int32).reshape(n, 1)

    def in_map(i, j):
        # Clamp so duplicate tiles of an odd split stay in-bounds; the kernel
        # masks them out via the unclamped global row id.
        return (jnp.minimum(i * tiles_per_split + j, last_block), 0)

    input_vmem = 2 * tile_n * row_bytes
    vmem_limit = int(min(vmem_capacity - 8 * 2**20, input_vmem + 8 * 2**20))
    vmem_limit = max(vmem_limit, 16 * 2**20)

    kernel = functools.partial(_focal_loss_kernel, gamma=float(gamma),
                               n_total=n, tiles_per_split=int(tiles_per_split))

    partials = pl.pallas_call(
        kernel,
        out_shape=jax.ShapeDtypeStruct((n_split, 1, 1), jnp.float32),
        grid_spec=pltpu.PrefetchScalarGridSpec(
            num_scalar_prefetch=0,
            grid=(n_split, tiles_per_split),
            in_specs=[
                pl.BlockSpec((tile_n, c), in_map),
                pl.BlockSpec((tile_n, 1), in_map),
            ],
            out_specs=pl.BlockSpec((1, 1, 1), lambda i, j: (i, 0, 0)),
            scratch_shapes=[pltpu.VMEM((1, 1), jnp.float32)],
        ),
        compiler_params=pltpu.CompilerParams(
            dimension_semantics=("parallel", "arbitrary"),
            vmem_limit_bytes=vmem_limit,
        ),
    )(logits, target2d)

    return jnp.sum(partials) / jnp.float32(n)


if __name__ == "__main__":
    key = jax.random.PRNGKey(0)
    k1, k2 = jax.random.split(key)

    # Case 1: small batch, gamma=2 (integer fast path), single tile.
    N, C = 8, 32
    logits = jax.random.normal(k1, (N, C), dtype=jnp.float32)
    target = jax.random.randint(k2, (N,), 0, C, dtype=jnp.int32)

    loss = focal_loss(logits, target, gamma=2.0)
    jax.block_until_ready(loss)

    logp_ref = jax.nn.logsumexp(logits, axis=-1) - jnp.take_along_axis(
        logits, target[:, None], axis=-1)[:, 0]
    p_ref = jnp.exp(-logp_ref)
    ref = jnp.mean((1.0 - p_ref) ** 2.0 * logp_ref)
    assert jnp.allclose(loss, ref, atol=1e-5, rtol=1e-5), (loss, ref)

    # Case 2: ragged batch over a 2-way-split multi-tile grid (no padding copy),
    # gamma=0 (plain mean CE).  Exercises the partial last block and the
    # clamped duplicate tile path.
    N2, C2 = 37, 16
    logits2 = jax.random.normal(k1, (N2, C2), dtype=jnp.float32)
    target2 = jax.random.randint(k2, (N2,), 0, C2, dtype=jnp.int32)

    loss2 = focal_loss(logits2, target2, gamma=0.0, max_tile_n=16)
    jax.block_until_ready(loss2)

    logp2 = jax.nn.logsumexp(logits2, axis=-1) - jnp.take_along_axis(
        logits2, target2[:, None], axis=-1)[:, 0]
    ref2 = jnp.mean(logp2)
    assert jnp.allclose(loss2, ref2, atol=1e-5, rtol=1e-5), (loss2, ref2)

    # Case 3: bf16 logits streamed unconverted, non-integer gamma (exp/log path).
    N3, C3 = 24, 128
    logits3 = jax.random.normal(k1, (N3, C3), dtype=jnp.bfloat16)
    target3 = jax.random.randint(k2, (N3,), 0, C3, dtype=jnp.int32)

    loss3 = focal_loss(logits3, target3, gamma=1.5, max_tile_n=8)
    jax.block_until_ready(loss3)

    x3 = logits3.astype(jnp.float32)
    logp3 = jax.nn.logsumexp(x3, axis=-1) - jnp.take_along_axis(
        x3, target3[:, None], axis=-1)[:, 0]
    p3 = jnp.exp(-logp3)
    ref3 = jnp.mean((1.0 - p3) ** 1.5 * logp3)
    assert jnp.allclose(loss3, ref3, atol=1e-4, rtol=1e-4), (loss3, ref3)

    print("KERNEL_OK")
</pallas_src>

<mosaic_0001>
module attributes {stable_mosaic.version = 11 : i64} {
  func.func @_focal_loss_kernel(%arg0: i32, %arg1: i32, %arg2: memref<8x32xf32, #tpu.memory_space<vmem>>, %arg3: memref<8x1xi32, #tpu.memory_space<vmem>>, %arg4: memref<1x1x1xf32, #tpu.memory_space<vmem>>, %arg5: memref<1x1xf32, #tpu.memory_space<vmem>>) attributes {dimension_semantics = [#tpu.dimension_semantics<parallel>, #tpu.dimension_semantics<arbitrary>], iteration_bounds = array<i64: 1, 1>, scalar_prefetch = 0 : i64, scratch_operands = 1 : i64, tpu.core_type = #tpu.core_type<tc>, window_params = [{transform_indices = @transform_0, window_bounds = array<i64: 8, 32>}, {transform_indices = @transform_1, window_bounds = array<i64: 8, 1>}, {transform_indices = @transform_2, window_bounds = array<i64: 1, 1, 1>}]} {
    %c0_i32 = arith.constant 0 : i32
    %0 = arith.cmpi eq, %arg1, %c0_i32 : i32
    %1 = arith.extui %0 : i1 to i32
    %c0_i32_0 = arith.constant 0 : i32
    %2 = arith.cmpi ne, %1, %c0_i32_0 : i32
    scf.if %2 {
      %cst_19 = arith.constant 0.000000e+00 : f32
      %49 = vector.broadcast %cst_19 : f32 to vector<1x1xf32>
      %c0_20 = arith.constant 0 : index
      %c0_21 = arith.constant 0 : index
      %50 = vector.load %arg5[%c0_20, %c0_21] : memref<1x1xf32, #tpu.memory_space<vmem>>, vector<1x1xf32>
      tpu.vector_store %arg5[%c0_20, %c0_21], %49 {strides = array<i32>} : memref<1x1xf32, #tpu.memory_space<vmem>>, vector<1x1xf32>,
    } else {
    }
    %c0 = arith.constant 0 : index
    %c0_1 = arith.constant 0 : index
    %3 = vector.load %arg2[%c0, %c0_1] : memref<8x32xf32, #tpu.memory_space<vmem>>, vector<8x32xf32>
    %c0_2 = arith.constant 0 : index
    %c0_3 = arith.constant 0 : index
    %4 = vector.load %arg3[%c0_2, %c0_3] : memref<8x1xi32, #tpu.memory_space<vmem>>, vector<8x1xi32>
    %c1_i32 = arith.constant 1 : i32
    %5 = arith.muli %arg0, %c1_i32 : i32
    %6 = arith.addi %5, %arg1 : i32
    %c8_i32 = arith.constant 8 : i32
    %7 = arith.muli %6, %c8_i32 : i32
    %8 = tpu.iota {dimensions = array<i32: 0>} : vector<8x1xi32>
    %9 = vector.broadcast %7 : i32 to vector<8x1xi32>
    %10 = arith.addi %9, %8 : vector<8x1xi32>
    %c8_i32_4 = arith.constant 8 : i32
    %11 = vector.broadcast %c8_i32_4 : i32 to vector<8x1xi32>
    %12 = arith.cmpi slt, %10, %11 : vector<8x1xi32>
    %cst = arith.constant dense<0xFF800000> : vector<8xf32>
    %13 = vector.multi_reduction <maximumf>, %3, %cst [1] : vector<8x32xf32> to vector<8xf32>
    %14 = vector.shape_cast %13 : vector<8xf32> to vector<8x1xf32>
    %15 = vector.broadcast %14 : vector<8x1xf32> to vector<8x32xf32>
    %16 = arith.subf %3, %15 : vector<8x32xf32>
    %17 = math.exp %16 : vector<8x32xf32>
    %cst_5 = arith.constant dense<0.000000e+00> : vector<8xf32>
    %18 = vector.multi_reduction <add>, %17, %cst_5 [1] : vector<8x32xf32> to vector<8xf32>
    %19 = vector.shape_cast %18 : vector<8xf32> to vector<8x1xf32>
    %20 = math.log %19 : vector<8x1xf32>
    %21 = arith.addf %14, %20 : vector<8x1xf32>
    %22 = tpu.iota {dimensions = array<i32: 1>} : vector<8x32xi32>
    %23 = vector.broadcast %4 : vector<8x1xi32> to vector<8x32xi32>
    %24 = arith.cmpi eq, %22, %23 : vector<8x32xi32>
    %cst_6 = arith.constant 0.000000e+00 : f32
    %25 = vector.broadcast %cst_6 : f32 to vector<8x32xf32>
    %26 = arith.select %24, %3, %25 : vector<8x32xi1>, vector<8x32xf32>
    %cst_7 = arith.constant dense<0.000000e+00> : vector<8xf32>
    %27 = vector.multi_reduction <add>, %26, %cst_7 [1] : vector<8x32xf32> to vector<8xf32>
    %28 = vector.shape_cast %27 : vector<8xf32> to vector<8x1xf32>
    %29 = arith.subf %21, %28 : vector<8x1xf32>
    %cst_8 = arith.constant 0.000000e+00 : f32
    %30 = vector.broadcast %cst_8 : f32 to vector<8x1xf32>
    %31 = arith.maximumf %29, %30 : vector<8x1xf32>
    %cst_9 = arith.constant 0.000000e+00 : f32
    %32 = vector.broadcast %cst_9 : f32 to vector<8x1xf32>
    %33 = arith.subf %32, %31 : vector<8x1xf32>
    %34 = math.exp %33 : vector<8x1xf32>
    %cst_10 = arith.constant 1.000000e+00 : f32
    %35 = vector.broadcast %cst_10 : f32 to vector<8x1xf32>
    %36 = arith.subf %35, %34 : vector<8x1xf32>
    %37 = arith.mulf %36, %36 : vector<8x1xf32>
    %38 = arith.mulf %37, %31 : vector<8x1xf32>
    %cst_11 = arith.constant 0.000000e+00 : f32
    %39 = vector.broadcast %cst_11 : f32 to vector<8x1xf32>
    %40 = arith.select %12, %38, %39 : vector<8x1xi1>, vector<8x1xf32>
    %c0_12 = arith.constant 0 : index
    %c0_13 = arith.constant 0 : index
    %41 = vector.load %arg5[%c0_12, %c0_13] : memref<1x1xf32, #tpu.memory_space<vmem>>, vector<1x1xf32>
    %cst_14 = arith.constant dense<0.000000e+00> : vector<1xf32>
    %42 = vector.multi_reduction <add>, %40, %cst_14 [0] : vector<8x1xf32> to vector<1xf32>
    %43 = vector.shape_cast %42 : vector<1xf32> to vector<1x1xf32>
    %44 = arith.addf %41, %43 : vector<1x1xf32>
    %c0_15 = arith.constant 0 : index
    %c0_16 = arith.constant 0 : index
    %45 = vector.load %arg5[%c0_15, %c0_16] : memref<1x1xf32, #tpu.memory_space<vmem>>, vector<1x1xf32>
    tpu.vector_store %arg5[%c0_15, %c0_16], %44 {strides = array<i32>} : memref<1x1xf32, #tpu.memory_space<vmem>>, vector<1x1xf32>,
    %c0_i32_17 = arith.constant 0 : i32
    %46 = arith.cmpi eq, %arg1, %c0_i32_17 : i32
    %47 = arith.extui %46 : i1 to i32
    %c0_i32_18 = arith.constant 0 : i32
    %48 = arith.cmpi ne, %47, %c0_i32_18 : i32
    scf.if %48 {
      %c0_19 = arith.constant 0 : index
      %c0_20 = arith.constant 0 : index
      %49 = vector.load %arg5[%c0_19, %c0_20] : memref<1x1xf32, #tpu.memory_space<vmem>>, vector<1x1xf32>
      %50 = vector.shape_cast %49 : vector<1x1xf32> to vector<1x1x1xf32>
      %c0_21 = arith.constant 0 : index
      %c0_22 = arith.constant 0 : index
      %c0_23 = arith.constant 0 : index
      %51 = vector.load %arg4[%c0_21, %c0_22, %c0_23] : memref<1x1x1xf32, #tpu.memory_space<vmem>>, vector<1x1x1xf32>
      tpu.vector_store %arg4[%c0_21, %c0_22, %c0_23], %50 {strides = array<i32>} : memref<1x1x1xf32, #tpu.memory_space<vmem>>, vector<1x1x1xf32>,
    } else {
    }
    return
  }
  func.func @transform_0(%arg0: i32, %arg1: i32) -> (i32, i32) {
    %c1_i32 = arith.constant 1 : i32
    %0 = arith.muli %arg0, %c1_i32 : i32
    %1 = arith.addi %0, %arg1 : i32
    %c0_i32 = arith.constant 0 : i32
    %2 = arith.minsi %1, %c0_i32 : i32
    %c0_i32_0 = arith.constant 0 : i32
    %c0_i32_1 = arith.constant 0 : i32
    return %2, %c0_i32_0 : i32, i32
  }
  func.func @transform_1(%arg0: i32, %arg1: i32) -> (i32, i32) {
    %c1_i32 = arith.constant 1 : i32
    %0 = arith.muli %arg0, %c1_i32 : i32
    %1 = arith.addi %0, %arg1 : i32
    %c0_i32 = arith.constant 0 : i32
    %2 = arith.minsi %1, %c0_i32 : i32
    %c0_i32_0 = arith.constant 0 : i32
    %c0_i32_1 = arith.constant 0 : i32
    return %2, %c0_i32_0 : i32, i32
  }
  func.func @transform_2(%arg0: i32, %arg1: i32) -> (i32, i32, i32) {
    %c0_i32 = arith.constant 0 : i32
    %c0_i32_0 = arith.constant 0 : i32
    %c0_i32_1 = arith.constant 0 : i32
    return %arg0, %c0_i32, %c0_i32_0 : i32, i32, i32
  }
}

</mosaic_0001>

<bundles_post_ra>
// kernel: tpu_custom_call.1
= control target key start
LH: loop header
LB: loop body
LE: loop exit
PB: predicated region body
PF: predicated region fallthrough
CT: control target
= control target key end

     0   :  { %vm81_vm0 = vcmask 261120   ;;  %s225_s0 = inlined_call_operand.vmem [shape: f32[8,32], index: 0, kind: input, shape index: {}]   ;;  %s226_s1 = inlined_call_operand.vmem [shape: s32[8,1], index: 1, kind: input, shape index: {}]   ;;  %s227_s2 = inlined_call_operand.hbm [shape: f32[1,1,1], index: 2, kind: output, shape index: {}]  }
   0x1   :  { %v72_v0 = vld [vmem:[%s225_s0] sm:$0xff] }
   0x2   :  { %7 = vsyncpa [#allocation4], 0  ;;  %v82_v1 = vsel %vm81_vm0, %v72_v0, -inf  ;;  %v192_v2 = vmov 0   ;;  %v73_v3 = vld [vmem:[%s226_s1] sm:$0xff]  ;;  %v94_v9 = vlaneseq  ;;  %vm70_vm2 = vcmask 0  }
   0x3   :  { %159 = vset.pattern.permute.xlu0 %v192_v2  ;;  %v193_v15 = vmov 0.0   ;;  %s194_s0 = smov [#allocation3]   ;;  %s135_s15 = sshll.u32 %s227_s2, 4  ;;  %s136_s15 = int_to_ptr.hbm [resolvable:$true] %s135_s15 }
   0x4   :  { %83 = vmax.xlane.f32.xlu0 %v82_v1  ;;  %v95_v10 = vand.u32 127, %v94_v9  ;;  %71 = vst.msk [vmem:[#allocation2] sm:$0x1] %vm70_vm2, %v193_v15  ;;  %s133_s1 = sshll.u32 %s194_s0, 4  ;;  %s134_s1 = int_to_ptr.vmem [resolvable:$true] %s133_s1 }
   0xb   :  { %v113_v33 = vld [vmem:[#allocation2] sm:$0x1] }
  0x18   :  { %97 = vperm.xlu0 %159, %v73_v3  }
  0x77   :  { %v84_v4 = vpop.xlane.xlu0 %83 }
  0x78   :  { %v85_v5 = vsub.f32 %v72_v0, %v84_v4 }
  0x7a   :  { %v86_v6 = vmul.f32 1.442695, %v85_v5 }
  0x7c   :  { %160 = vpow2.f32 %v86_v6 }
  0x82   :  { %v161_v7 = vpop.eup %160 }
  0x83   :  { %v88_v8 = vsel %vm81_vm0, %v161_v7, 0.0 }
  0x84   :  { %89 = vadd.xlane.f32.xlu1 %v88_v8 }
  0x8a   :  { %v98_v11 = vpop.permute.xlu0 %97 }
  0x8b   :  { %vm99_vm1 = vcmp.eq.s32.totalorder %v95_v10, %v98_v11 }
  0x8c   :  { %v100_v12 = vsel %vm99_vm1, %v72_v0, 0.0 }
  0x8d   :  { %v101_v13 = vsel %vm81_vm0, %v100_v12, 0.0 }
  0x8e   :  { %102 = vadd.xlane.f32.xlu1 %v101_v13 }
  0xf7   :  { %v90_v14 = vpop.xlane.xlu1 %89 }
  0xf8   :  { %162 = vlog2.f32 %v90_v14 }
  0xfe   :  { %v163_v16 = vpop.eup %162 }
  0xff   :  { %v92_v17 = vmul.f32 0.6931472, %v163_v16 }
 0x101   :  { %v93_v18 = vadd.f32 %v92_v17, %v84_v4  ;;  %v103_v19 = vpop.xlane.xlu1 %102 }
 0x103   :  { %v104_v20 = vsub.f32 %v93_v18, %v103_v19 }
 0x105   :  { %v105_v21 = vmax.f32 %v104_v20, 0.0 }
 0x107   :  { %v106_v22 = vsub.f32 0.0, %v105_v21 }
 0x109   :  { %v107_v23 = vmul.f32 1.442695, %v106_v22 }
 0x10b   :  { %164 = vpow2.f32 %v107_v23 }
 0x111   :  { %v165_v24 = vpop.eup %164 }
 0x112   :  { %v109_v25 = vsub.f32 1.0, %v165_v24 }
 0x114   :  { %v110_v26 = vmul.f32 %v109_v25, %v109_v25 }
 0x116   :  { %v111_v27 = vmul.f32 %v110_v26, %v105_v21 }
 0x118   :  { %v114_v28 = vrot.slane %v111_v27, 4 }
 0x11a   :  { %v115_v29 = vadd.f32 %v114_v28, %v111_v27 }
 0x11c   :  { %v116_v30 = vrot.slane %v115_v29, 2 }
 0x11e   :  { %v117_v31 = vadd.f32 %v116_v30, %v115_v29 }
 0x120   :  { %v118_v32 = vrot.slane %v117_v31, 1 }
 0x122   :  { %v119_v34 = vadd.f32 %v118_v32, %v117_v31 }
 0x124   :  { %v120_v35 = vadd.f32 %v119_v34, %v113_v33 }
 0x126   :  { %122 = vst.msk [vmem:[#allocation2] sm:$0x1] %vm70_vm2, %v120_v35 }
 0x12d   :  { %v126_v36 = vld [vmem:[#allocation2] sm:$0x1] }
 0x12e   :  { %127 = vst.msk [vmem:[#allocation3] sm:$0x1] %vm70_vm2, %v126_v36 }
 0x12f   :  { %138 = dma.vmem_to_hbm [thread:$0]  %s134_s1, 16, %s136_s15, [#allocation4]  }
 0x130   :  { %190 = dma.done.wait [#allocation4], 16  }
 0x131   :  { %191 = vsyncadd [#allocation4], 4294967280 }
 0x132   :  { %143 = vsyncpa [#allocation4], 1 }

</bundles_post_ra>
